<compile_context>
chip_gen: v7x
topology: tpu7x:2x2x1
jax: 0.10.0
libtpu: 0.0.40
codegen_flags: <defaults>
</compile_context>

<pallas_src>
import functools

import jax
import jax.numpy as jnp
import numpy as np
from jax import lax
from jax.experimental import pallas as pl
from jax.experimental.pallas import tpu as pltpu


def _interp_matrix(out_size: int, in_size: int) -> np.ndarray:
    """Row-stochastic bilinear interpolation matrix M: out[i] = sum_p M[i, p] * in[p].

    align_corners=False semantics (modern PyTorch default for
    F.upsample/F.interpolate(mode='bilinear')).
    """
    i = np.arange(out_size, dtype=np.float64)
    src = (i + 0.5) * (in_size / out_size) - 0.5
    src = np.clip(src, 0.0, None)  # PyTorch clamps negative source coords to 0
    i0 = np.minimum(np.floor(src).astype(np.int64), in_size - 1)
    i1 = np.minimum(i0 + 1, in_size - 1)
    w1 = src - i0
    w0 = 1.0 - w1
    M = np.zeros((out_size, in_size), dtype=np.float64)
    M[np.arange(out_size), i0] += w0
    M[np.arange(out_size), i1] += w1
    return M.astype(np.float32)


def _round_up(x: int, m: int) -> int:
    return ((x + m - 1) // m) * m


def _ce_kernel(x_ref, tgt_ref, a_ref, bt_ref, out_ref, *scratch,
               num_classes, w_in, ignore_index, chunk, use_fori):
    # x_ref  : (1, h_in, C*w_in)   bf16   whole per-sample preds, height-major
    # tgt_ref: (1, tile_h, W_pad)  int32  target tile
    # a_ref  : (tile_h, h_in)      f32    height-interp rows for this H tile
    # bt_ref : (w_in, W_pad)       f32    width-interp matrix (pre-transposed)
    # out_ref: (1, 1, 1, 2)        f32    [loss_sum, valid_count] partials
    tile_h = tgt_ref.shape[1]
    W = tgt_ref.shape[2]

    A = a_ref[...].astype(jnp.bfloat16)      # bf16 MXU operands, f32 accumulation
    Bt = bt_ref[...].astype(jnp.bfloat16)
    tgt = tgt_ref[0]

    def chunk_update(hblk, k, base, carry):
        """Consume k height-interpolated channels. hblk: (tile_h, k*w_in) bf16.

        One width matmul per channel, a chunk-max tree (VPU), then a single
        rescale exp + one exp per channel (EUP) for the online softmax.
        """
        m, s, picked = carry
        ups = []
        for j in range(k):
            t_c = hblk[:, j * w_in:(j + 1) * w_in]                      # static lane slice
            ups.append(jnp.dot(t_c, Bt, preferred_element_type=jnp.float32))
        cmax = ups[0]
        for u in ups[1:]:
            cmax = jnp.maximum(cmax, u)
        m_new = jnp.maximum(m, cmax)
        s_new = s * jnp.exp(m - m_new)                                  # one rescale exp
        for j, u in enumerate(ups):
            s_new = s_new + jnp.exp(u - m_new)                          # one exp / channel
            picked = picked + jnp.where(tgt == base + j, u, 0.0)
        return m_new, s_new, picked

    carry = (jnp.full((tile_h, W), -jnp.inf, jnp.float32),   # running max
             jnp.zeros((tile_h, W), jnp.float32),            # running sum of exp
             jnp.zeros((tile_h, W), jnp.float32))            # target-class logit

    full_chunks = num_classes // chunk
    rem = num_classes % chunk

    def height_block(lo, k):
        # Merged height interpolation for k channels: (tile_h,h_in)@(h_in,k*w_in)
        xg = x_ref[0, :, lo * w_in:(lo + k) * w_in]
        return jnp.dot(A, xg, preferred_element_type=jnp.float32).astype(jnp.bfloat16)

    if not use_fori:
        # Small class count: fully unrolled (static slices only).
        for g in range(full_chunks + (1 if rem else 0)):
            lo = g * chunk
            k = min(chunk, num_classes - lo)
            carry = chunk_update(height_block(lo, k), k, lo, carry)
    else:
        # Large class count: bound code size / live ranges with a fori_loop.
        th_ref = scratch[0]                  # (full_chunks, tile_h, chunk*w_in) bf16
        for g in range(full_chunks):         # fill (static indices, merged matmuls)
            th_ref[g] = height_block(g * chunk, chunk)

        def body(g, c):
            # Dynamic index only on the leading (untiled) scratch axis.
            return chunk_update(th_ref[g], chunk, g * chunk, c)

        carry = lax.fori_loop(0, full_chunks, body, carry)
        if rem:
            lo = full_chunks * chunk
            carry = chunk_update(height_block(lo, rem), rem, lo, carry)

    m, s, picked = carry
    lse = m + jnp.log(s)
    valid = tgt != ignore_index
    loss_map = jnp.where(valid, lse - picked, 0.0)

    loss_sum = jnp.sum(loss_map).reshape(1, 1, 1, 1)
    cnt = jnp.sum(valid.astype(jnp.float32)).reshape(1, 1, 1, 1)
    out_ref[...] = jnp.concatenate([loss_sum, cnt], axis=-1)


def criterion_cross_entropy(preds, target, ignore_index=255):
    """preds: (N, C, h_in, w_in) float; target: (N, H, W) int. Scalar mean loss.

    NaN if every pixel is ignore_index (0/0), matching PyTorch's 'mean' reduction.
    """
    N, C, h_in, w_in = map(int, preds.shape)
    H, W = int(target.shape[1]), int(target.shape[2])

    chunk = min(8, C)
    use_fori = C > 32
    W_pad = _round_up(W, 128)

    # --- generation-aware VMEM budget / tile_h selection ---
    try:
        vmem_cap = int(pltpu.get_tpu_info().vmem_capacity_bytes)
    except Exception:
        vmem_cap = 64 * 1024 * 1024          # conservative (v7x-sized) fallback
    # ~48 MiB scoped on 64 MiB v7x; up to ~100 MiB on 128 MiB v5e / v6e.
    vmem_limit = min(int(0.75 * vmem_cap), 100 * 1024 * 1024)
    budget = int(0.8 * vmem_limit)

    # Bytes that scale with tile_h (double-buffered blocks + live f32 planes).
    per_row = (2 * W_pad * 4                 # target block (int32, 2 buffers)
               + 2 * h_in * 4                # A block (f32, 2 buffers)
               + (chunk + 6) * W_pad * 4)    # chunk of up planes + m/s/picked/...
    if use_fori:
        per_row += C * w_in * 2              # height-interp scratch (bf16)
    fixed = (2 * h_in * C * w_in * 2         # preds block (bf16, 2 buffers)
             + 2 * w_in * W_pad * 4)         # Bt block (f32, 2 buffers)
    t_max = max(8, min((budget - fixed) // per_row, 512))
    t_max = (t_max // 8) * 8
    t_max = min(t_max, _round_up(H, 8))
    n_t = -(-H // t_max)                               # cdiv
    tile_h = _round_up(-(-H // n_t), 8)                # balance tiles -> min padding
    H_pad = tile_h * n_t

    # Interpolation matrices (f32 at the pallas_call boundary -> simple BlockSpec
    # tiling; cast to bf16 inside the kernel).  Padded rows/cols are zero and the
    # corresponding padded targets are ignore_index, so they contribute nothing.
    A_np = _interp_matrix(H, h_in)                     # (H, h_in)
    if H_pad > H:
        A_np = np.concatenate([A_np, np.zeros((H_pad - H, h_in), np.float32)], axis=0)
    Bt_np = _interp_matrix(W, w_in).T                  # (w_in, W)
    if W_pad > W:
        Bt_np = np.concatenate([Bt_np, np.zeros((w_in, W_pad - W), np.float32)], axis=1)
    A = jnp.asarray(A_np)
    Bt = jnp.asarray(Bt_np)

    # Height-first layout feeding the merged height matmuls; bf16 MXU operand.
    preds_hm = jnp.transpose(preds, (0, 2, 1, 3)).reshape(N, h_in, C * w_in)
    preds_hm = preds_hm.astype(jnp.bfloat16)

    tgt = target.astype(jnp.int32)
    if H_pad > H or W_pad > W:
        tgt = jnp.pad(tgt, ((0, 0), (0, H_pad - H), (0, W_pad - W)),
                      constant_values=ignore_index)

    kernel = functools.partial(_ce_kernel, num_classes=C, w_in=w_in,
                               ignore_index=ignore_index, chunk=chunk,
                               use_fori=use_fori)
    scratch_shapes = []
    if use_fori:
        scratch_shapes = [pltpu.VMEM((C // chunk, tile_h, chunk * w_in), jnp.bfloat16)]

    parts = pl.pallas_call(
        kernel,
        out_shape=jax.ShapeDtypeStruct((N, n_t, 1, 2), jnp.float32),
        grid_spec=pltpu.PrefetchScalarGridSpec(
            num_scalar_prefetch=0,
            grid=(N, n_t),
            in_specs=[
                pl.BlockSpec((1, h_in, C * w_in), lambda n, t: (n, 0, 0)),
                pl.BlockSpec((1, tile_h, W_pad), lambda n, t: (n, t, 0)),
                pl.BlockSpec((tile_h, h_in), lambda n, t: (t, 0)),
                pl.BlockSpec((w_in, W_pad), lambda n, t: (0, 0)),
            ],
            out_specs=pl.BlockSpec((1, 1, 1, 2), lambda n, t: (n, t, 0, 0)),
            scratch_shapes=scratch_shapes,
        ),
        compiler_params=pltpu.CompilerParams(
            # Independent partial per (n, h_tile): both axes megacore-parallel.
            dimension_semantics=("parallel", "parallel"),
            vmem_limit_bytes=int(vmem_limit),
        ),
    )(preds_hm, tgt, A, Bt)

    # Final mean over valid pixels (NaN if none are valid, as in PyTorch).
    return jnp.sum(parts[..., 0]) / jnp.sum(parts[..., 1])


def _reference_loss(preds, target, ignore_index=255):
    """Pure-JAX f32 reference using the same interpolation matrices."""
    N, C, h_in, w_in = preds.shape
    H, W = int(target.shape[1]), int(target.shape[2])
    A = jnp.asarray(_interp_matrix(H, h_in))
    B = jnp.asarray(_interp_matrix(W, w_in))
    up = jnp.einsum('hp,ncpq,wq->nchw', A, preds, B)                   # (N, C, H, W)
    logz = jax.scipy.special.logsumexp(up, axis=1)                     # (N, H, W)
    safe_tgt = jnp.where(target == ignore_index, 0, target)
    picked = jnp.take_along_axis(up, safe_tgt[:, None, :, :], axis=1)[:, 0]
    valid = target != ignore_index
    loss = jnp.where(valid, logz - picked, 0.0)
    return jnp.sum(loss) / jnp.sum(valid.astype(jnp.float32))


if __name__ == "__main__":
    # bf16 MXU operands (f32 accumulation) -> compare against the f32 reference
    # with a deliberately loosened tolerance.
    RTOL = ATOL = 2e-2

    # Test 1: small shapes consistent with the module (unrolled channel path).
    key = jax.random.PRNGKey(0)
    k1, k2, k3 = jax.random.split(key, 3)
    N, C, h_in, w_in, H, W = 2, 4, 8, 8, 16, 16
    preds = jax.random.normal(k1, (N, C, h_in, w_in), dtype=jnp.float32)
    target = jax.random.randint(k2, (N, H, W), 0, C, dtype=jnp.int32)
    ignore_mask = jax.random.bernoulli(k3, 0.1, (N, H, W))
    target = jnp.where(ignore_mask, jnp.int32(255), target)

    loss = jax.block_until_ready(criterion_cross_entropy(preds, target, 255))
    ref = _reference_loss(preds, target, 255)
    assert jnp.allclose(loss, ref, rtol=RTOL, atol=ATOL), (loss, ref)

    # Test 2: many classes -> exercises the fori_loop + VMEM-scratch path.
    k4, k5, k6 = jax.random.split(jax.random.PRNGKey(1), 3)
    N2, C2, h2, w2, H2, W2 = 2, 40, 4, 4, 8, 8
    preds_b = jax.random.normal(k4, (N2, C2, h2, w2), dtype=jnp.float32)
    target_b = jax.random.randint(k5, (N2, H2, W2), 0, C2, dtype=jnp.int32)
    ignore_b = jax.random.bernoulli(k6, 0.1, (N2, H2, W2))
    target_b = jnp.where(ignore_b, jnp.int32(255), target_b)

    loss_b = jax.block_until_ready(criterion_cross_entropy(preds_b, target_b, 255))
    ref_b = _reference_loss(preds_b, target_b, 255)
    assert jnp.allclose(loss_b, ref_b, rtol=RTOL, atol=ATOL), (loss_b, ref_b)

    print("KERNEL_OK")
</pallas_src>

<mosaic_0001>
module attributes {stable_mosaic.version = 11 : i64} {
  func.func @_ce_kernel(%arg0: i32, %arg1: i32, %arg2: memref<1x8x32xbf16, #tpu.memory_space<vmem>>, %arg3: memref<1x16x128xi32, #tpu.memory_space<vmem>>, %arg4: memref<16x8xf32, #tpu.memory_space<vmem>>, %arg5: memref<8x128xf32, #tpu.memory_space<vmem>>, %arg6: memref<1x1x1x2xf32, #tpu.memory_space<vmem>>) attributes {dimension_semantics = [#tpu.dimension_semantics<parallel>, #tpu.dimension_semantics<parallel>], iteration_bounds = array<i64: 2, 1>, scalar_prefetch = 0 : i64, scratch_operands = 0 : i64, tpu.core_type = #tpu.core_type<tc>, window_params = [{transform_indices = @transform_0, window_bounds = array<i64: 1, 8, 32>}, {transform_indices = @transform_1, window_bounds = array<i64: 1, 16, 128>}, {transform_indices = @transform_2, window_bounds = array<i64: 16, 8>}, {pipeline_mode = #tpu.pipeline_mode<synchronous>, transform_indices = @transform_3, window_bounds = array<i64: 8, 128>}, {transform_indices = @transform_4, window_bounds = array<i64: 1, 1, 1, 2>}]} {
    %c0 = arith.constant 0 : index
    %c0_0 = arith.constant 0 : index
    %0 = vector.load %arg4[%c0, %c0_0] : memref<16x8xf32, #tpu.memory_space<vmem>>, vector<16x8xf32>
    %1 = arith.truncf %0 : vector<16x8xf32> to vector<16x8xbf16>
    %c0_1 = arith.constant 0 : index
    %c0_2 = arith.constant 0 : index
    %2 = vector.load %arg5[%c0_1, %c0_2] : memref<8x128xf32, #tpu.memory_space<vmem>>, vector<8x128xf32>
    %3 = arith.truncf %2 : vector<8x128xf32> to vector<8x128xbf16>
    %c0_3 = arith.constant 0 : index
    %c0_4 = arith.constant 0 : index
    %c0_5 = arith.constant 0 : index
    %4 = vector.load %arg3[%c0_3, %c0_4, %c0_5] : memref<1x16x128xi32, #tpu.memory_space<vmem>>, vector<1x16x128xi32>
    %5 = vector.shape_cast %4 : vector<1x16x128xi32> to vector<16x128xi32>
    %cst = arith.constant 0xFF800000 : f32
    %6 = vector.broadcast %cst : f32 to vector<16x128xf32>
    %cst_6 = arith.constant 0.000000e+00 : f32
    %7 = vector.broadcast %cst_6 : f32 to vector<16x128xf32>
    %cst_7 = arith.constant 0.000000e+00 : f32
    %8 = vector.broadcast %cst_7 : f32 to vector<16x128xf32>
    %c0_8 = arith.constant 0 : index
    %c0_9 = arith.constant 0 : index
    %c0_10 = arith.constant 0 : index
    %9 = vector.load %arg2[%c0_8, %c0_9, %c0_10] : memref<1x8x32xbf16, #tpu.memory_space<vmem>>, vector<1x8x32xbf16>
    %10 = vector.shape_cast %9 : vector<1x8x32xbf16> to vector<8x32xbf16>
    %cst_11 = arith.constant dense<0.000000e+00> : vector<16x32xf32>
    %11 = tpu.matmul %1, %10, %cst_11 {dimension_numbers = #tpu.dot_dimension_numbers<[1], [0], [0], [1], [0, 0, 1, 1], [], []>} : vector<16x8xbf16>, vector<8x32xbf16>, vector<16x32xf32> -> vector<16x32xf32>
    %12 = arith.truncf %11 : vector<16x32xf32> to vector<16x32xbf16>
    %13 = vector.extract_strided_slice %12 {offsets = [0, 0], sizes = [16, 8], strides = [1, 1]} : vector<16x32xbf16> to vector<16x8xbf16>
    %cst_12 = arith.constant dense<0.000000e+00> : vector<16x128xf32>
    %14 = tpu.matmul %13, %3, %cst_12 {dimension_numbers = #tpu.dot_dimension_numbers<[1], [0], [0], [1], [0, 0, 1, 1], [], []>} : vector<16x8xbf16>, vector<8x128xbf16>, vector<16x128xf32> -> vector<16x128xf32>
    %15 = vector.extract_strided_slice %12 {offsets = [0, 8], sizes = [16, 8], strides = [1, 1]} : vector<16x32xbf16> to vector<16x8xbf16>
    %cst_13 = arith.constant dense<0.000000e+00> : vector<16x128xf32>
    %16 = tpu.matmul %15, %3, %cst_13 {dimension_numbers = #tpu.dot_dimension_numbers<[1], [0], [0], [1], [0, 0, 1, 1], [], []>} : vector<16x8xbf16>, vector<8x128xbf16>, vector<16x128xf32> -> vector<16x128xf32>
    %17 = vector.extract_strided_slice %12 {offsets = [0, 16], sizes = [16, 8], strides = [1, 1]} : vector<16x32xbf16> to vector<16x8xbf16>
    %cst_14 = arith.constant dense<0.000000e+00> : vector<16x128xf32>
    %18 = tpu.matmul %17, %3, %cst_14 {dimension_numbers = #tpu.dot_dimension_numbers<[1], [0], [0], [1], [0, 0, 1, 1], [], []>} : vector<16x8xbf16>, vector<8x128xbf16>, vector<16x128xf32> -> vector<16x128xf32>
    %19 = vector.extract_strided_slice %12 {offsets = [0, 24], sizes = [16, 8], strides = [1, 1]} : vector<16x32xbf16> to vector<16x8xbf16>
    %cst_15 = arith.constant dense<0.000000e+00> : vector<16x128xf32>
    %20 = tpu.matmul %19, %3, %cst_15 {dimension_numbers = #tpu.dot_dimension_numbers<[1], [0], [0], [1], [0, 0, 1, 1], [], []>} : vector<16x8xbf16>, vector<8x128xbf16>, vector<16x128xf32> -> vector<16x128xf32>
    %21 = arith.maximumf %14, %16 : vector<16x128xf32>
    %22 = arith.maximumf %21, %18 : vector<16x128xf32>
    %23 = arith.maximumf %22, %20 : vector<16x128xf32>
    %24 = arith.maximumf %6, %23 : vector<16x128xf32>
    %25 = arith.subf %6, %24 : vector<16x128xf32>
    %26 = math.exp %25 : vector<16x128xf32>
    %27 = arith.mulf %7, %26 : vector<16x128xf32>
    %28 = arith.subf %14, %24 : vector<16x128xf32>
    %29 = math.exp %28 : vector<16x128xf32>
    %30 = arith.addf %27, %29 : vector<16x128xf32>
    %c0_i32 = arith.constant 0 : i32
    %31 = vector.broadcast %c0_i32 : i32 to vector<16x128xi32>
    %32 = arith.cmpi eq, %5, %31 : vector<16x128xi32>
    %cst_16 = arith.constant 0.000000e+00 : f32
    %33 = vector.broadcast %cst_16 : f32 to vector<16x128xf32>
    %34 = arith.select %32, %14, %33 : vector<16x128xi1>, vector<16x128xf32>
    %35 = arith.addf %8, %34 : vector<16x128xf32>
    %36 = arith.subf %16, %24 : vector<16x128xf32>
    %37 = math.exp %36 : vector<16x128xf32>
    %38 = arith.addf %30, %37 : vector<16x128xf32>
    %c1_i32 = arith.constant 1 : i32
    %39 = vector.broadcast %c1_i32 : i32 to vector<16x128xi32>
    %40 = arith.cmpi eq, %5, %39 : vector<16x128xi32>
    %cst_17 = arith.constant 0.000000e+00 : f32
    %41 = vector.broadcast %cst_17 : f32 to vector<16x128xf32>
    %42 = arith.select %40, %16, %41 : vector<16x128xi1>, vector<16x128xf32>
    %43 = arith.addf %35, %42 : vector<16x128xf32>
    %44 = arith.subf %18, %24 : vector<16x128xf32>
    %45 = math.exp %44 : vector<16x128xf32>
    %46 = arith.addf %38, %45 : vector<16x128xf32>
    %c2_i32 = arith.constant 2 : i32
    %47 = vector.broadcast %c2_i32 : i32 to vector<16x128xi32>
    %48 = arith.cmpi eq, %5, %47 : vector<16x128xi32>
    %cst_18 = arith.constant 0.000000e+00 : f32
    %49 = vector.broadcast %cst_18 : f32 to vector<16x128xf32>
    %50 = arith.select %48, %18, %49 : vector<16x128xi1>, vector<16x128xf32>
    %51 = arith.addf %43, %50 : vector<16x128xf32>
    %52 = arith.subf %20, %24 : vector<16x128xf32>
    %53 = math.exp %52 : vector<16x128xf32>
    %54 = arith.addf %46, %53 : vector<16x128xf32>
    %c3_i32 = arith.constant 3 : i32
    %55 = vector.broadcast %c3_i32 : i32 to vector<16x128xi32>
    %56 = arith.cmpi eq, %5, %55 : vector<16x128xi32>
    %cst_19 = arith.constant 0.000000e+00 : f32
    %57 = vector.broadcast %cst_19 : f32 to vector<16x128xf32>
    %58 = arith.select %56, %20, %57 : vector<16x128xi1>, vector<16x128xf32>
    %59 = arith.addf %51, %58 : vector<16x128xf32>
    %60 = math.log %54 : vector<16x128xf32>
    %61 = arith.addf %24, %60 : vector<16x128xf32>
    %c255_i32 = arith.constant 255 : i32
    %62 = vector.broadcast %c255_i32 : i32 to vector<16x128xi32>
    %63 = arith.cmpi ne, %5, %62 : vector<16x128xi32>
    %64 = arith.subf %61, %59 : vector<16x128xf32>
    %cst_20 = arith.constant 0.000000e+00 : f32
    %65 = vector.broadcast %cst_20 : f32 to vector<16x128xf32>
    %66 = arith.select %63, %64, %65 : vector<16x128xi1>, vector<16x128xf32>
    %67 = vector.shape_cast %66 : vector<16x128xf32> to vector<1x16x128xf32>
    %cst_21 = arith.constant dense<0.000000e+00> : vector<1xf32>
    %68 = vector.multi_reduction <add>, %67, %cst_21 [1, 2] : vector<1x16x128xf32> to vector<1xf32>
    %69 = vector.shape_cast %68 : vector<1xf32> to vector<1x1x1xf32>
    %70 = vector.extract %69[0, 0, 0] : f32 from vector<1x1x1xf32>
    %71 = vector.broadcast %70 : f32 to vector<1x1x1x1xf32>
    %72 = arith.extui %63 : vector<16x128xi1> to vector<16x128xi32>
    %73 = arith.sitofp %72 : vector<16x128xi32> to vector<16x128xf32>
    %74 = vector.shape_cast %73 : vector<16x128xf32> to vector<1x16x128xf32>
    %cst_22 = arith.constant dense<0.000000e+00> : vector<1xf32>
    %75 = vector.multi_reduction <add>, %74, %cst_22 [1, 2] : vector<1x16x128xf32> to vector<1xf32>
    %76 = vector.shape_cast %75 : vector<1xf32> to vector<1x1x1xf32>
    %77 = vector.extract %76[0, 0, 0] : f32 from vector<1x1x1xf32>
    %78 = vector.broadcast %77 : f32 to vector<1x1x1x1xf32>
    %79 = tpu.concatenate %71, %78 in 3 : vector<1x1x1x1xf32>, vector<1x1x1x1xf32> -> vector<1x1x1x2xf32>
    %c0_23 = arith.constant 0 : index
    %c0_24 = arith.constant 0 : index
    %c0_25 = arith.constant 0 : index
    %c0_26 = arith.constant 0 : index
    %80 = vector.load %arg6[%c0_23, %c0_24, %c0_25, %c0_26] : memref<1x1x1x2xf32, #tpu.memory_space<vmem>>, vector<1x1x1x2xf32>
    tpu.vector_store %arg6[%c0_23, %c0_24, %c0_25, %c0_26], %79 {strides = array<i32>} : memref<1x1x1x2xf32, #tpu.memory_space<vmem>>, vector<1x1x1x2xf32>,
    return
  }
  func.func @transform_0(%arg0: i32, %arg1: i32) -> (i32, i32, i32) {
    %c0_i32 = arith.constant 0 : i32
    %c0_i32_0 = arith.constant 0 : i32
    %c0_i32_1 = arith.constant 0 : i32
    return %arg0, %c0_i32, %c0_i32_0 : i32, i32, i32
  }
  func.func @transform_1(%arg0: i32, %arg1: i32) -> (i32, i32, i32) {
    %c0_i32 = arith.constant 0 : i32
    %c0_i32_0 = arith.constant 0 : i32
    return %arg0, %arg1, %c0_i32 : i32, i32, i32
  }
  func.func @transform_2(%arg0: i32, %arg1: i32) -> (i32, i32) {
    %c0_i32 = arith.constant 0 : i32
    %c0_i32_0 = arith.constant 0 : i32
    return %arg1, %c0_i32 : i32, i32
  }
  func.func @transform_3(%arg0: i32, %arg1: i32) -> (i32, i32) {
    %c0_i32 = arith.constant 0 : i32
    %c0_i32_0 = arith.constant 0 : i32
    %c0_i32_1 = arith.constant 0 : i32
    return %c0_i32, %c0_i32_0 : i32, i32
  }
  func.func @transform_4(%arg0: i32, %arg1: i32) -> (i32, i32, i32, i32) {
    %c0_i32 = arith.constant 0 : i32
    %c0_i32_0 = arith.constant 0 : i32
    %c0_i32_1 = arith.constant 0 : i32
    return %arg0, %arg1, %c0_i32, %c0_i32_0 : i32, i32, i32, i32
  }
}

</mosaic_0001>

<bundles_post_ra>
// kernel: tpu_custom_call.1
= control target key start
LH: loop header
LB: loop body
LE: loop exit
PB: predicated region body
PF: predicated region fallthrough
CT: control target
= control target key end

     0   :  { %9 = vsyncpa [#allocation3], 0  ;;  %s1301_s0 = inlined_call_operand.vmem [shape: bf16[2,8,32], index: 0, kind: input, shape index: {}]   ;;  %s1302_s1 = inlined_call_operand.hbm [shape: s32[2,16,128], index: 1, kind: input, shape index: {}]   ;;  %s1303_s2 = inlined_call_operand.vmem [shape: f32[16,8], index: 2, kind: input, shape index: {}]   ;;  %s1304_s3 = inlined_call_operand.vmem [shape: f32[8,128], index: 3, kind: input, shape index: {}]   ;;  %s1305_s4 = inlined_call_operand.hbm [shape: f32[2,1,1,2], index: 4, kind: output, shape index: {}]  }
   0x1   :  { %11 = vsyncpa [#allocation3 + $0x1], 0 }
   0x2   :  { %12 = vsyncpa [#allocation4], 0 }
   0x3   :  { %14 = vsyncpa [#allocation4 + $0x1], 0  ;;  %s1056_s15 = smov 0   ;;  %s1058_s16 = smov 0  }
   0x4   :  { %s1060_s17 = smov 0   ;;  %s1062_s18 = smov 0  }
   0x5   :  { %s1064_s19 = smov 0   ;;  %s1066_s20 = smov 0  }
   0x6 LB: > { %s749_s21 = sadd.s32 4294967295, %s1020_s20   ;;  %s750_s22 = sadd.s32 4294967294, %s1020_s20   ;;  %s1020_s20 = sphi %s1066_s20, %s20_s20   ;;  %s1016_s19 = sphi %s1064_s19, %s1320_s19   ;;  %s1012_s18 = sphi %s1062_s18, %s1319_s18   ;;  %s1008_s17 = sphi %s1060_s17, %s1318_s17   ;;  %s1004_s16 = sphi %s1058_s16, %s1317_s16   ;;  %s1000_s15 = sphi %s1056_s15, %s1316_s15  }
   0x7   : > { %s32_s23 = sadd.s32 1, %s1016_s19  ;;  %s67_s24 = sadd.s32 1, %s1008_s17 }
   0x8   : > { %p34_p0 = scmp.ge.s32.totalorder %s32_s23, 2  ;;  %p74_p1 = scmp.ne.s32.totalorder %s1008_s17, %s1004_s16 }
   0x9   : > { %p75_p2 = scmp.eq.s32.totalorder %s1020_s20, 0  ;;  %p80_p3 = scmp.ne.s32.totalorder %s1004_s16, %s1000_s15 }
   0xa   : > { %s1322_s23 = smov (%p34_p0, %s32_s23), 0  ;;  %p81_p5 = scmp.eq.s32.totalorder %s749_s21, 0 }
   0xb   : > { %p1097_p4 = por %p75_p2, %p74_p1  ;;  %s62_s26 = ssub.s32 %s1016_s19, %s1322_s23 }
   0xc   : > { %p153_p6 = scmp.eq.s32.totalorder %s749_s21, 1  ;;  %p65_p7 = scmp.eq.s32.totalorder %s62_s26, 0 }
   0xd   : > { %p1103_p8 = por %p81_p5, %p80_p3  ;;  %p159_p10 = scmp.eq.s32.totalorder %s750_s22, 1 }
   0xe   : > { %p1107_p9 = por %p153_p6, %p74_p1  ;;  %p827_p13 = scmp.lt.s32.totalorder %s1020_s20, 2 }
   0xf   : > { %s1112_s29 = scalar_select %p65_p7, %s1008_s17, %s67_s24  }
  0x10   : > { %s1309_s28 = scalar_select %p1107_p9, 1, 0 }
  0x11   : > { %p1114_p11 = por %p159_p10, %p80_p3  ;;  %s198_s5 = sand.u32 1, %s1008_s17  }
  0x12   : > { %s754_s6 = sshll.u32 %s198_s5, 4  ;;  %s770_s7 = sshll.u32 %s1016_s19, 8 }
  0x13   : > { %s1310_s30 = scalar_select %p1114_p11, 1, 0 }
  0x14   : > { %s1125_s10 = scalar_lea.hbm %s1302_s1, %s770_s7  ;;  %s202_s11 = scalar_lea.vmem [#allocation2], %s754_s6 }
  0x15   : > { %s211_s12 = sshll.u32 %s202_s11, 4  ;;  %p1131_p0 = pnand %p827_p13, %p1097_p4  ;;  %s1127_s12 = int_to_ptr.vmem [resolvable:$true] %s211_s12 }
  0x16   : > { %s1136_s14 = scalar_lea.sflag [#allocation3], %s198_s5  ;;  %s908_s21 = scalar_lea.hbm %s1125_s10, 256 }
  0x17   : > { %p909_p2 = scmp.ne.s32.totalorder %s1125_s10, %s908_s21  ;;  %p910_p3 = pneg %p1131_p0 }
  0x18   : > { %s913_s25 = scalar_lea.hbm %s1302_s1, 512  ;;  %p914_p4 = scmp.lt.u32.totalorder %s1125_s10, %s1302_s1 }
  0x19   : > { %p911_p5 = pnand %p910_p3, %p909_p2  ;;  %p915_p7 = scmp.lt.u32.totalorder %s913_s25, %s908_s21 }
  0x1a   : > { %p917_p13 = scmp.lt.u32.totalorder %s908_s21, %s1125_s10 }
  0x1b   : > { %p912_p6 = pneg %p911_p5  ;;  %p916_p10 = por %p915_p7, %p914_p4 }
  0x1d   : > { %p918_p12 = por %p917_p13, %p916_p10 }
  0x1f   : > { %p919_p1 = pnand %p918_p12, %p912_p6 }
  0x21   : > { %922 = shalt.err (!%p919_p1)
}
  0x22   : > { %s923_s5 = scalar_lea.vmem %s1127_s12, 256  ;;  %s1022_s7 = smov [#allocation2]  }
  0x23   : > { %p924_p2 = scmp.ne.s32.totalorder %s1127_s12, %s923_s5  ;;  %s928_s8 = sshll.u32 %s1022_s7, 4  ;;  %s929_s8 = int_to_ptr.vmem [resolvable:$false] %s928_s8 }
  0x24   : > { %s930_s9 = scalar_lea.vmem %s929_s8, 512  ;;  %p931_p9 = scmp.lt.s32.totalorder %s1127_s12, %s929_s8 }
  0x25   : > { %p926_p5 = pnand %p924_p2, %p910_p3  ;;  %p932_p4 = scmp.lt.s32.totalorder %s930_s9, %s923_s5 }
  0x27   : > { %p927_p11 = pneg %p926_p5  ;;  %p933_p7 = por %p932_p4, %p931_p9 }
  0x29   : > { %p934_p10 = pnand %p933_p7, %p927_p11 }
  0x2b   : > { %937 = shalt.err (!%p934_p10)
}
  0x2c   : > { %s1023_s11 = smov 128   ;;  %s1024_s21 = smov 8  }
  0x2d   : > { %822 = dma.hbm_to_vmem [thread:$0]  (!%p1131_p0), %s1125_s10, 256, %s1127_s12, %s1136_s14, %s1023_s11, %s1023_s11, %s1024_s21  }
  0x2e   : > { %p219_p12 = scmp.lt.s32.totalorder %s1020_s20, 3  ;;  %p1312_p1 = scmp.ge.s32.totalorder %s1020_s20, 1 }
  0x30   : > { %p220_p3 = pnand %p1312_p1, %p219_p12 }
  0x31   : > { %s1168_s22 = sand.u32 (!%p220_p3), 1, %s1004_s16  }
  0x32   : > { %223 = sbr.rel (%p220_p3) target bundleno = 892 (0x37c), region = 36  ;;  %s758_s24 = sshll.u32 (!%p220_p3), %s1168_s22, 4 }
  0x33   : > { %s226_s25 = scalar_lea.sflag (!%p220_p3), [#allocation3], %s1168_s22  ;;  %s1172_s26 = scalar_lea.vmem (!%p220_p3), [#allocation2], %s758_s24 }
  0x39   : > { %991 = dma.done.wait (%p1103_p8), %s226_s25, 256  }
  0x3a   : > { %993 = vsyncadd (%p1103_p8), %s226_s25, 4294967040  ;;  %p262_p9 = scmp.lt.s32.totalorder %s1012_s18, 1  ;;  %v1025_v0 = vmov 0.0   ;;  %vm1026_vm0 = vmmov 0   ;;  %vm286_vm1 = vcmask 1043456   ;;  %v277_v1 = vld [vmem:[%s1304_s3] sm:$0xff] }
  0x3b   : > { %781 = vmatprep.subr.bf16.mxu0 %v1025_v0  ;;  %783 = vmatprep.mubr.msk.bf16.mxu0 %vm1026_vm0, %v1025_v0  ;;  %v274_v3 = vld [vmem:[%s1303_s2] sm:$0xff]  ;;  %v278_v4 = vpack.c.bf16 %v277_v1, %v277_v1  ;;  %v275_v6 = vld [vmem:[%s1303_s2 + $0x8] sm:$0xff]  ;;  %vm282_vm2 = vcmask 64512   ;;  %s1027_s21 = smov 104   ;;  %s1028_s24 = smov 120   ;;  %vm626_vm13 = vcmask 7168  }
  0x3c   : > { %s263_s10 = scalar_select %p262_p9, %s1012_s18, 1  ;;  %787 = vmatprep.subr.bf16.mxu1 %v1025_v0  ;;  %789 = vmatprep.mubr.msk.bf16.mxu1 %vm1026_vm0, %v1025_v0  ;;  %v276_v7 = vpack.c.bf16 %v275_v6, %v274_v3  ;;  %v1207_v21 = vld [vmem:[%s1172_s26] sm:$0xff]  ;;  %v1210_v22 = vld [vmem:[%s1172_s26 + $0x8] sm:$0xff]  ;;  %vm628_vm14 = vcmask 8192  }
  0x3d   : > { %v336_v8 = vsel %vm286_vm1, %v278_v4, 0  ;;  %s1029_s25 = smov 112   ;;  %vm594_vm3 = vcmp.ne.s32.totalorder %v1207_v21, 255  ;;  %vm595_vm4 = vcmp.ne.s32.totalorder %v1210_v22, 255  ;;  %vm540_vm5 = vcmp.eq.s32.totalorder %v1207_v21, 0  ;;  %s767_s26 = sshll.u32 %s1012_s18, 4 }
  0x3e   : > { %s759_s12 = sshll.u32 %s263_s10, 2  ;;  %788 = vmatpush3.bf16.msra.mxu1 %v336_v8  ;;  %v765_v23 = vsel %vm594_vm3, 1.0, %v1025_v0  ;;  %v766_v24 = vsel %vm595_vm4, 1.0, %v1025_v0  ;;  %vm554_vm6 = vcmp.eq.s32.totalorder %v1207_v21, 1  ;;  %vm541_vm7 = vcmp.eq.s32.totalorder %v1210_v22, 0  ;;  %s261_s10 = scalar_lea.vmem [#allocation5], %s1168_s22 }
  0x3f   : > { %s265_s6 = scalar_lea.vmem %s1301_s0, %s759_s12  ;;  %799 = vmatprep.subr.bf16.mxu1 %v1025_v0  ;;  %v615_v25 = vadd.f32 %v766_v24, %v765_v23  ;;  %vm555_vm8 = vcmp.eq.s32.totalorder %v1210_v22, 1  ;;  %vm568_vm9 = vcmp.eq.s32.totalorder %v1207_v21, 2  ;;  %vm569_vm10 = vcmp.eq.s32.totalorder %v1210_v22, 2  ;;  %s644_s12 = sshll.u32 %s261_s10, 4  ;;  %s1254_s12 = int_to_ptr.vmem [resolvable:$true] %s644_s12 }
  0x40   : > { %v281_v2 = vld [vmem:[%s265_s6] sm:$0xf]  ;;  %vm582_vm11 = vcmp.eq.s32.totalorder %v1207_v21, 3  ;;  %vm583_vm12 = vcmp.eq.s32.totalorder %v1210_v22, 3  ;;  %s1252_s5 = scalar_lea.hbm %s1305_s4, %s767_s26  ;;  %s631_s18 = scalar_lea.sflag [#allocation4], %s1168_s22 }
  0x41   : > { %v288_v5 = vsel %vm286_vm1, %v281_v2, 0  ;;  %s938_s7 = scalar_lea.vmem %s1254_s12, 16  ;;  %p1313_p11 = scmp.ne.s32.totalorder %s1309_s28, 0 }
  0x42   : > { %782 = vmatpush3.bf16.msra.mxu0 %v288_v5  ;;  %p939_p8 = scmp.ne.s32.totalorder %s1254_s12, %s938_s7  ;;  %s1030_s8 = smov [#allocation5]  }
  0x43   : > { %793 = vmatprep.subr.bf16.mxu0 %v1025_v0  ;;  %s942_s9 = sshll.u32 %s1030_s8, 4  ;;  %s943_s9 = int_to_ptr.vmem [resolvable:$false] %s942_s9 }
  0x44   : > { %p940_p0 = pnand %p939_p8, %p1313_p11  ;;  %s944_s11 = scalar_lea.vmem %s943_s9, 32 }
  0x45   : > { %784 = vmatmul.mubr.msk.bf16.vlgmr.msra.gmra.mrb[0].mxu0 %vm282_vm2, %v276_v7  ;;  %p945_p13 = scmp.lt.s32.totalorder %s1254_s12, %s943_s9  ;;  %p946_p2 = scmp.lt.s32.totalorder %s944_s11, %s938_s7 }
  0x46   : > { %794 = vmatpush3.bf16.msra.mxu0 %v336_v8  ;;  %795 = vmatprep.mubr.msk.bf16.mxu0 %vm1026_vm0, %v1025_v0  ;;  %p941_p6 = pneg %p940_p0 }
  0x47   : > { %805 = vmatprep.subr.bf16.mxu0 %v1025_v0  ;;  %p947_p5 = por %p946_p2, %p945_p13 }
  0x49   : > { %p948_p4 = pnand %p947_p5, %p941_p6 }
 0x118   : > { %v324_v9 = vpop.f32.mrb[0].mxu0 }
 0x119   : > { %v785_v10 = vpop.f32.mrb[1].mxu0 }
 0x11a   : > { %v327_v11 = vpop.f32.mrb[2].mxu0 }
 0x11b   : > { %v331_v12 = vpack.c.bf16 %v327_v11, %v324_v9  ;;  %v786_v13 = vpop.f32.mrb[3].mxu0 }
 0x11d   : > { %472 = vrot.lane.b32.xlu1 %v331_v12, %s1027_s21  ;;  %380 = vrot.lane.b32.xlu0 %v331_v12, %s1028_s24 }
 0x11e   : > { %790 = vmatmul.mubr.msk.bf16.vlgmr.msra.gmra.mrb[0].mxu1 %vm282_vm2, %v331_v12 }
 0x11f   : > { %800 = vmatpush3.bf16.msra.mxu1 %v336_v8  ;;  %801 = vmatprep.mubr.msk.bf16.mxu1 %vm1026_vm0, %v1025_v0 }
 0x121   : > { %426 = vrot.lane.b32.xlu0 %v331_v12, %s1029_s25 }
 0x140   : > { %616 = vadd.xlane.f32.xlu0 %v615_v25 }
 0x18f   : > { %v381_v14 = vpop.permute.xlu0 %380  ;;  %v473_v16 = vpop.permute.xlu1 %472 }
 0x190   : > { %796 = vmatmul.mubr.msk.bf16.vlgmr.msra.gmra.mrb[4].mxu0 %vm282_vm2, %v381_v14 }
 0x191   : > { %806 = vmatpush3.bf16.msra.mxu0 %v336_v8  ;;  %807 = vmatprep.mubr.msk.bf16.mxu0 %vm1026_vm0, %v1025_v0 }
 0x193   : > { %v427_v15 = vpop.permute.xlu0 %426 }
 0x194   : > { %802 = vmatmul.mubr.msk.bf16.vlgmr.msra.gmra.mrb[4].mxu1 %vm282_vm2, %v427_v15 }
 0x198   : > { %808 = vmatmul.mubr.msk.bf16.vlgmr.msra.gmra.mrb[8].mxu0 %vm282_vm2, %v473_v16 }
 0x1f1   : > { %v1202_v17 = vpop.f32.mrb[0].mxu1 }
 0x1f2   : > { %v791_v18 = vpop.f32.mrb[1].mxu1  ;;  %v542_v27 = vsel %vm540_vm5, %v1202_v17, 0.0 }
 0x1f3   : > { %v1204_v19 = vpop.f32.mrb[2].mxu1 }
 0x1f4   : > { %v792_v20 = vpop.f32.mrb[3].mxu1  ;;  %v543_v33 = vsel %vm541_vm7, %v1204_v19, 0.0 }
 0x263   : > { %v419_v26 = vpop.f32.mrb[4].mxu0 }
 0x264   : > { %v518_v28 = vmax.f32 %v1202_v17, %v419_v26  ;;  %v556_v29 = vsel %vm554_vm6, %v419_v26, 0.0  ;;  %v797_v30 = vpop.f32.mrb[5].mxu0 }
 0x265   : > { %v558_v31 = vadd.f32 %v556_v29, %v542_v27  ;;  %v422_v32 = vpop.f32.mrb[6].mxu0 }
 0x266   : > { %v519_v34 = vmax.f32 %v1204_v19, %v422_v32  ;;  %v557_v35 = vsel %vm555_vm8, %v422_v32, 0.0  ;;  %v798_v36 = vpop.f32.mrb[7].mxu0 }
 0x267   : > { %v559_v37 = vadd.f32 %v557_v35, %v543_v33  ;;  %v465_v38 = vpop.f32.mrb[4].mxu1 }
 0x268   : > { %v520_v39 = vmax.f32 %v518_v28, %v465_v38  ;;  %v570_v40 = vsel %vm568_vm9, %v465_v38, 0.0  ;;  %v803_v41 = vpop.f32.mrb[5].mxu1 }
 0x269   : > { %v572_v42 = vadd.f32 %v570_v40, %v558_v31  ;;  %v468_v43 = vpop.f32.mrb[6].mxu1 }
 0x26a   : > { %v521_v44 = vmax.f32 %v519_v34, %v468_v43  ;;  %v571_v45 = vsel %vm569_vm10, %v468_v43, 0.0  ;;  %v804_v46 = vpop.f32.mrb[7].mxu1 }
 0x26b   : > { %v573_v47 = vadd.f32 %v571_v45, %v559_v37  ;;  %v511_v48 = vpop.f32.mrb[8].mxu0 }
 0x26c   : > { %v1229_v49 = vmax.f32 %v520_v39, %v511_v48  ;;  %v584_v50 = vsel %vm582_vm11, %v511_v48, 0.0  ;;  %v809_v51 = vpop.f32.mrb[9].mxu0 }
 0x26d   : > { %v1232_v52 = vadd.f32 %v584_v50, %v572_v42  ;;  %v514_v53 = vpop.f32.mrb[10].mxu0 }
 0x26e   : > { %v532_v54 = vsub.f32 %v1202_v17, %v1229_v49  ;;  %v546_v55 = vsub.f32 %v419_v26, %v1229_v49  ;;  %v560_v56 = vsub.f32 %v465_v38, %v1229_v49  ;;  %v810_v57 = vpop.f32.mrb[11].mxu0  ;;  %v574_v58 = vsub.f32 %v511_v48, %v1229_v49 }
 0x26f   : > { %v523_v59 = vmax.f32 %v521_v44, %v514_v53  ;;  %v585_v60 = vsel %vm583_vm12, %v514_v53, 0.0  ;;  %v524_v63 = vsub.f32 -inf, %v1229_v49 }
 0x270   : > { %v587_v61 = vadd.f32 %v585_v60, %v573_v47  ;;  %v534_v6 = vmul.f32 1.442695, %v532_v54  ;;  %v548_v8 = vmul.f32 1.442695, %v546_v55  ;;  %v562_v10 = vmul.f32 1.442695, %v560_v56  ;;  %v617_v47 = vpop.xlane.xlu0 %616 }
 0x271   : > { %v533_v62 = vsub.f32 %v1204_v19, %v523_v59  ;;  %v547_v0 = vsub.f32 %v422_v32, %v523_v59  ;;  %v561_v1 = vsub.f32 %v468_v43, %v523_v59  ;;  %v575_v2 = vsub.f32 %v514_v53, %v523_v59 }
 0x272   : > { %v525_v3 = vsub.f32 -inf, %v523_v59  ;;  %v526_v4 = vmul.f32 1.442695, %v524_v63  ;;  %v576_v12 = vmul.f32 1.442695, %v574_v58  ;;  %v618_v48 = vrot.slane %v617_v47, 4 }
 0x273   : > { %v536_v7 = vmul.f32 1.442695, %v533_v62  ;;  %v550_v9 = vmul.f32 1.442695, %v547_v0  ;;  %v564_v11 = vmul.f32 1.442695, %v561_v1 }
 0x274   : > { %v528_v5 = vmul.f32 1.442695, %v525_v3  ;;  %884 = vpow2.f32 %v526_v4  ;;  %v578_v13 = vmul.f32 1.442695, %v575_v2  ;;  %v619_v50 = vadd.f32 %v618_v48, %v617_v47 }
 0x276   : > { %886 = vpow2.f32 %v528_v5  ;;  %v620_v51 = vrot.slane %v619_v50, 2 }
 0x277   : > { %888 = vpow2.f32 %v534_v6 }
 0x278   : > { %890 = vpow2.f32 %v536_v7  ;;  %v621_v55 = vadd.f32 %v620_v51, %v619_v50 }
 0x279   : > { %892 = vpow2.f32 %v548_v8 }
 0x27a   : > { %894 = vpow2.f32 %v550_v9  ;;  %v622_v57 = vrot.slane %v621_v55, 1 }
 0x27b   : > { %896 = vpow2.f32 %v562_v10 }
 0x27c   : > { %898 = vpow2.f32 %v564_v11 }
 0x27d   : > { %900 = vpow2.f32 %v576_v12 }
 0x27e   : > { %902 = vpow2.f32 %v578_v13  ;;  %v885_v14 = vpop.eup %884 }
 0x27f   : > { %v530_v16 = vmul.f32 0.0, %v885_v14 }
 0x280   : > { %v887_v15 = vpop.eup %886 }
 0x281   : > { %v889_v17 = vpop.eup %888  ;;  %v531_v18 = vmul.f32 0.0, %v887_v15 }
 0x282   : > { %v891_v19 = vpop.eup %890  ;;  %v538_v20 = vadd.f32 %v889_v17, %v530_v16 }
 0x283   : > { %v893_v23 = vpop.eup %892  ;;  %v539_v24 = vadd.f32 %v891_v19, %v531_v18 }
 0x284   : > { %v895_v25 = vpop.eup %894  ;;  %v552_v26 = vadd.f32 %v893_v23, %v538_v20 }
 0x285   : > { %v897_v27 = vpop.eup %896  ;;  %v553_v28 = vadd.f32 %v895_v25, %v539_v24 }
 0x286   : > { %v899_v29 = vpop.eup %898  ;;  %v566_v30 = vadd.f32 %v897_v27, %v552_v26 }
 0x287   : > { %v901_v31 = vpop.eup %900  ;;  %v567_v32 = vadd.f32 %v899_v29, %v553_v28 }
 0x288   : > { %v903_v33 = vpop.eup %902  ;;  %v580_v34 = vadd.f32 %v901_v31, %v566_v30 }
 0x289   : > { %v581_v35 = vadd.f32 %v903_v33, %v567_v32 }
 0x28a   : > { %904 = vlog2.f32 %v580_v34 }
 0x28b   : > { %906 = vlog2.f32 %v581_v35 }
 0x294   : > { %v905_v36 = vpop.eup %904 }
 0x295   : > { %v907_v37 = vpop.eup %906  ;;  %v589_v38 = vmul.f32 0.6931472, %v905_v36 }
 0x296   : > { %v591_v39 = vmul.f32 0.6931472, %v907_v37 }
 0x297   : > { %v592_v40 = vadd.f32 %v589_v38, %v1229_v49 }
 0x298   : > { %v593_v41 = vadd.f32 %v591_v39, %v523_v59  ;;  %v623_v59 = vadd.f32 %v622_v57, %v621_v55 }
 0x299   : > { %v596_v42 = vsub.f32 %v592_v40, %v1232_v52 }
 0x29a   : > { %v597_v43 = vsub.f32 %v593_v41, %v587_v61 }
 0x29b   : > { %v598_v44 = vsel %vm594_vm3, %v596_v42, 0.0 }
 0x29c   : > { %v599_v45 = vsel %vm595_vm4, %v597_v43, 0.0 }
 0x29d   : > { %v600_v46 = vadd.f32 %v599_v45, %v598_v44 }
 0x29f   : > { %601 = vadd.xlane.f32.xlu1 %v600_v46 }
 0x32c   : > { %v602_v53 = vpop.xlane.xlu1 %601 }
 0x32d   : > { %v603_v49 = vrot.slane %v602_v53, 4 }
 0x32f   : > { %v604_v54 = vadd.f32 %v603_v49, %v602_v53 }
 0x331   : > { %v605_v52 = vrot.slane %v604_v54, 2 }
 0x333   : > { %v606_v56 = vadd.f32 %v605_v52, %v604_v54 }
 0x335   : > { %v607_v21 = vrot.slane %v606_v56, 1 }
 0x337   : > { %v608_v58 = vadd.f32 %v607_v21, %v606_v56 }
 0x339   : > { %811 = vpush %v608_v58 }
 0x33a   : > { %813 = vpush %v623_v59 }
 0x36a   : > { %s812_s13 = spop %811 }
 0x36b   : > { %v610_v22 = vstv %s812_s13  ;;  %s814_s14 = spop %813 }
 0x36c   : > { %v625_v60 = vstv %s814_s14 }
 0x36d   : > { %v627_v61 = vsel %vm626_vm13, %v610_v22, %v625_v60 }
 0x36e   : > { %629 = vst.msk [vmem:[%s261_s10] sm:$0x1] %vm628_vm14, %v627_v61 }
 0x36f   : > { %951 = shalt.err (!%p948_p4)
}
 0x370   : > { %s952_s22 = scalar_lea.hbm %s1252_s5, 16  ;;  %s956_s25 = scalar_lea.hbm %s1305_s4, 32 }
 0x371   : > { %p953_p7 = scmp.ne.s32.totalorder %s1252_s5, %s952_s22  ;;  %p957_p1 = scmp.lt.u32.totalorder %s1252_s5, %s1305_s4 }
 0x372   : > { %p958_p3 = scmp.lt.u32.totalorder %s956_s25, %s952_s22  ;;  %p960_p8 = scmp.lt.u32.totalorder %s952_s22, %s1252_s5 }
 0x373   : > { %p954_p10 = pnand %p953_p7, %p1313_p11 }
 0x374   : > { %p959_p9 = por %p958_p3, %p957_p1 }
 0x375   : > { %p955_p12 = pneg %p954_p10 }
 0x376   : > { %p961_p0 = por %p960_p8, %p959_p9 }
 0x378   : > { %p962_p6 = pnand %p961_p0, %p955_p12 }
 0x37a   : > { %965 = shalt.err (!%p962_p6)
}
 0x37b   : > { %817 = dma.vmem_to_hbm [thread:$0]  (%p1313_p11), %s1254_s12, 16, %s1252_s5, %s631_s18  }
 0x37c PF: > { %s656_s13 = sand.u32 1, %s1000_s15   ;;  %p1314_p13 = scmp.ne.s32.totalorder %s1310_s30, 0 }
 0x37d   : > { %p1315_p2 = scmp.ge.s32.totalorder %s1020_s20, 2  ;;  %s657_s14 = scalar_lea.sflag [#allocation4], %s656_s13 }
 0x37f   : > { %p824_p5 = pnand %p1315_p2, %p1314_p13 }
 0x381   : > { %995 = dma.done.wait (!%p824_p5), %s657_s14, 16  }
 0x382   : > { %997 = vsyncadd (!%p824_p5), %s657_s14, 4294967280  ;;  %s20_s20 = sadd.s32 1, %s1020_s20   ;;  %s1316_s15 = smov %s1004_s16 }
 0x383   : > { %p17_p4 = scmp.ge.s32.totalorder %s20_s20, 4   ;;  %s1317_s16 = smov %s1008_s17 }
 0x384   : > { %s1318_s17 = smov %s1112_s29  ;;  %s1319_s18 = smov %s1016_s19 }
 0x385   : > { %s1320_s19 = smov %s1322_s23  ;;  %19 = sbr.rel (!%p17_p4) target bundleno = 6 (0x6), region = 87 }
 0x38c   :  { %661 = vsyncpa [#allocation3], 1 }
 0x38d   :  { %663 = vsyncpa [#allocation3 + $0x1], 1 }
 0x38e   :  { %664 = vsyncpa [#allocation4], 1 }
 0x38f   :  { %666 = vsyncpa [#allocation4 + $0x1], 1 }

</bundles_post_ra>
